<compile_context>
chip_gen: v6e
topology: v6e:2x2x1
jax: 0.10.0
libtpu: 0.0.40
codegen_flags: <defaults>
</compile_context>

<pallas_src>
import functools
import math

import jax
import jax.numpy as jnp
from jax.experimental import pallas as pl
from jax.experimental.pallas import tpu as pltpu


def _round_up(x, m):
    return ((x + m - 1) // m) * m


# ----------------------------------------------------------------------------
# Fused Pallas kernel:  support = x @ W  (once per batch, kept in VMEM)
#                       out_tile = adj_tile @ support + bias
# ----------------------------------------------------------------------------
def _gcn_kernel(x_ref, w_ref, adj_ref, b_ref, o_ref, support_ref):
    # Compute the (nodes, Fout) support matrix only on the first row-tile of
    # each batch element; it stays resident in VMEM scratch for later tiles.
    @pl.when(pl.program_id(1) == 0)
    def _():
        support_ref[...] = jnp.dot(
            x_ref[...], w_ref[...], preferred_element_type=jnp.float32)

    out = jnp.dot(adj_ref[...], support_ref[...],
                  preferred_element_type=jnp.float32)
    o_ref[...] = (out + b_ref[...]).astype(o_ref.dtype)


def graph_convolution(x, adj, weight, bias=None, *, row_tile=128):
    """GraphConvolution.forward as a single fused Pallas TPU kernel.

    x:      (B, N, Fin)  float32
    adj:    (B, N, N)    float32
    weight: (Fin, Fout)  float32
    bias:   (1, 1, Fout) float32 or None
    returns (B, N, Fout) float32
    """
    B, N, Fin = x.shape
    Fout = weight.shape[1]
    assert adj.shape == (B, N, N), adj.shape
    assert weight.shape[0] == Fin, weight.shape

    Fin_p = _round_up(Fin, 128)
    Fout_p = _round_up(Fout, 128)
    # Tile the node (output-row) axis; never fall back to one giant block.
    tn = row_tile if N > row_tile else _round_up(N, 8)
    N_p = _round_up(N, tn)

    x_p = jnp.pad(x, ((0, 0), (0, N_p - N), (0, Fin_p - Fin)))
    adj_p = jnp.pad(adj, ((0, 0), (0, N_p - N), (0, N_p - N)))
    w_p = jnp.pad(weight, ((0, Fin_p - Fin), (0, Fout_p - Fout)))
    if bias is None:
        b_p = jnp.zeros((1, Fout_p), jnp.float32)
    else:
        b_p = jnp.pad(bias.reshape(1, Fout), ((0, 0), (0, Fout_p - Fout)))

    grid = (B, N_p // tn)

    out_p = pl.pallas_call(
        _gcn_kernel,
        out_shape=jax.ShapeDtypeStruct((B, N_p, Fout_p), jnp.float32),
        grid=grid,
        in_specs=[
            pl.BlockSpec((None, N_p, Fin_p), lambda b, r: (b, 0, 0)),  # x
            pl.BlockSpec((Fin_p, Fout_p), lambda b, r: (0, 0)),        # W
            pl.BlockSpec((None, tn, N_p), lambda b, r: (b, r, 0)),     # adj rows
            pl.BlockSpec((1, Fout_p), lambda b, r: (0, 0)),            # bias
        ],
        out_specs=pl.BlockSpec((None, tn, Fout_p), lambda b, r: (b, r, 0)),
        scratch_shapes=[pltpu.VMEM((N_p, Fout_p), jnp.float32)],
        compiler_params=pltpu.CompilerParams(
            dimension_semantics=("parallel", "arbitrary")),
    )(x_p, w_p, adj_p, b_p)

    return out_p[:, :N, :Fout]


# ----------------------------------------------------------------------------
# Parameter init (matches GraphConvolution.reset_parameters).
# ----------------------------------------------------------------------------
def make_params(key, in_features, out_features, use_bias=True):
    stdv = 1.0 / math.sqrt(out_features)
    k_w, k_b = jax.random.split(key)
    weight = jax.random.uniform(
        k_w, (in_features, out_features), jnp.float32, -stdv, stdv)
    bias = None
    if use_bias:
        bias = jax.random.uniform(
            k_b, (1, 1, out_features), jnp.float32, -stdv, stdv)
    return weight, bias


def _reference(x, adj, weight, bias):
    support = jnp.matmul(x, weight)
    out = jnp.matmul(adj, support)
    if bias is not None:
        out = out + bias
    return out


if __name__ == "__main__":
    key = jax.random.PRNGKey(0)
    k_w, k_x, k_adj, k_w2, k_x2, k_adj2 = jax.random.split(key, 6)

    # --- small case (matches the module's forward: batched node features + adj)
    B, N, Fin, Fout = 2, 16, 16, 32
    weight, bias = make_params(k_w, Fin, Fout, use_bias=True)
    x = jax.random.normal(k_x, (B, N, Fin), jnp.float32)
    a = jax.random.uniform(k_adj, (B, N, N), jnp.float32)
    adj = a / jnp.sum(a, axis=-1, keepdims=True)   # row-normalized adjacency

    fwd = jax.jit(functools.partial(graph_convolution, row_tile=128))
    out = fwd(x, adj, weight, bias)
    jax.block_until_ready(out)

    ref = _reference(x, adj, weight, bias)
    assert out.shape == (B, N, Fout), out.shape
    assert bool(jnp.allclose(out, ref, atol=1e-4, rtol=1e-4)), \
        float(jnp.max(jnp.abs(out - ref)))

    # --- larger case: exercises multi-row-tile grid + bias=None path
    B2, N2, Fin2, Fout2 = 1, 256, 64, 96
    weight2, _ = make_params(k_w2, Fin2, Fout2, use_bias=False)
    x2 = jax.random.normal(k_x2, (B2, N2, Fin2), jnp.float32)
    a2 = jax.random.uniform(k_adj2, (B2, N2, N2), jnp.float32)
    adj2 = a2 / jnp.sum(a2, axis=-1, keepdims=True)

    out2 = jax.jit(functools.partial(graph_convolution, row_tile=128))(
        x2, adj2, weight2, None)
    jax.block_until_ready(out2)
    ref2 = _reference(x2, adj2, weight2, None)
    assert out2.shape == (B2, N2, Fout2), out2.shape
    assert bool(jnp.allclose(out2, ref2, atol=1e-3, rtol=1e-4)), \
        float(jnp.max(jnp.abs(out2 - ref2)))

    print("KERNEL_OK")
</pallas_src>

<mosaic_0001>
module attributes {stable_mosaic.version = 11 : i64} {
  func.func @_gcn_kernel(%arg0: i32, %arg1: i32, %arg2: memref<1x16x128xf32, #tpu.memory_space<vmem>>, %arg3: memref<128x128xf32, #tpu.memory_space<vmem>>, %arg4: memref<1x16x16xf32, #tpu.memory_space<vmem>>, %arg5: memref<1x128xf32, #tpu.memory_space<vmem>>, %arg6: memref<1x16x128xf32, #tpu.memory_space<vmem>>, %arg7: memref<16x128xf32, #tpu.memory_space<vmem>>) attributes {dimension_semantics = [#tpu.dimension_semantics<parallel>, #tpu.dimension_semantics<arbitrary>], iteration_bounds = array<i64: 2, 1>, scalar_prefetch = 0 : i64, scratch_operands = 1 : i64, tpu.core_type = #tpu.core_type<tc>, window_params = [{transform_indices = @transform_0, window_bounds = array<i64: 1, 16, 128>}, {pipeline_mode = #tpu.pipeline_mode<synchronous>, transform_indices = @transform_1, window_bounds = array<i64: 128, 128>}, {transform_indices = @transform_2, window_bounds = array<i64: 1, 16, 16>}, {pipeline_mode = #tpu.pipeline_mode<synchronous>, transform_indices = @transform_3, window_bounds = array<i64: 1, 128>}, {transform_indices = @transform_4, window_bounds = array<i64: 1, 16, 128>}]} {
    %c0_i32 = arith.constant 0 : i32
    %0 = arith.cmpi eq, %arg1, %c0_i32 : i32
    %1 = arith.extui %0 : i1 to i32
    %c0_i32_0 = arith.constant 0 : i32
    %2 = arith.cmpi ne, %1, %c0_i32_0 : i32
    scf.if %2 {
      %c0_10 = arith.constant 0 : index
      %c0_11 = arith.constant 0 : index
      %c0_12 = arith.constant 0 : index
      %13 = vector.load %arg2[%c0_10, %c0_11, %c0_12] : memref<1x16x128xf32, #tpu.memory_space<vmem>>, vector<1x16x128xf32>
      %14 = vector.shape_cast %13 : vector<1x16x128xf32> to vector<16x128xf32>
      %c0_13 = arith.constant 0 : index
      %c0_14 = arith.constant 0 : index
      %15 = vector.load %arg3[%c0_13, %c0_14] : memref<128x128xf32, #tpu.memory_space<vmem>>, vector<128x128xf32>
      %cst_15 = arith.constant dense<0.000000e+00> : vector<16x128xf32>
      %16 = tpu.matmul %14, %15, %cst_15 {dimension_numbers = #tpu.dot_dimension_numbers<[1], [0], [0], [1], [0, 0, 1, 1], [], []>} : vector<16x128xf32>, vector<128x128xf32>, vector<16x128xf32> -> vector<16x128xf32>
      %c0_16 = arith.constant 0 : index
      %c0_17 = arith.constant 0 : index
      %17 = vector.load %arg7[%c0_16, %c0_17] : memref<16x128xf32, #tpu.memory_space<vmem>>, vector<16x128xf32>
      tpu.vector_store %arg7[%c0_16, %c0_17], %16 {strides = array<i32>} : memref<16x128xf32, #tpu.memory_space<vmem>>, vector<16x128xf32>,
    } else {
    }
    %c0 = arith.constant 0 : index
    %c0_1 = arith.constant 0 : index
    %c0_2 = arith.constant 0 : index
    %3 = vector.load %arg4[%c0, %c0_1, %c0_2] : memref<1x16x16xf32, #tpu.memory_space<vmem>>, vector<1x16x16xf32>
    %4 = vector.shape_cast %3 : vector<1x16x16xf32> to vector<16x16xf32>
    %c0_3 = arith.constant 0 : index
    %c0_4 = arith.constant 0 : index
    %5 = vector.load %arg7[%c0_3, %c0_4] : memref<16x128xf32, #tpu.memory_space<vmem>>, vector<16x128xf32>
    %cst = arith.constant dense<0.000000e+00> : vector<16x128xf32>
    %6 = tpu.matmul %4, %5, %cst {dimension_numbers = #tpu.dot_dimension_numbers<[1], [0], [0], [1], [0, 0, 1, 1], [], []>} : vector<16x16xf32>, vector<16x128xf32>, vector<16x128xf32> -> vector<16x128xf32>
    %c0_5 = arith.constant 0 : index
    %c0_6 = arith.constant 0 : index
    %7 = vector.load %arg5[%c0_5, %c0_6] : memref<1x128xf32, #tpu.memory_space<vmem>>, vector<1x128xf32>
    %8 = vector.broadcast %7 : vector<1x128xf32> to vector<16x128xf32>
    %9 = arith.addf %6, %8 : vector<16x128xf32>
    %c0_7 = arith.constant 0 : index
    %c0_8 = arith.constant 0 : index
    %c0_9 = arith.constant 0 : index
    %10 = vector.load %arg6[%c0_7, %c0_8, %c0_9] : memref<1x16x128xf32, #tpu.memory_space<vmem>>, vector<1x16x128xf32>
    %11 = vector.shape_cast %10 : vector<1x16x128xf32> to vector<16x128xf32>
    %12 = vector.shape_cast %9 : vector<16x128xf32> to vector<1x16x128xf32>
    tpu.vector_store %arg6[%c0_7, %c0_8, %c0_9], %12 {strides = array<i32>} : memref<1x16x128xf32, #tpu.memory_space<vmem>>, vector<1x16x128xf32>,
    return
  }
  func.func @transform_0(%arg0: i32, %arg1: i32) -> (i32, i32, i32) {
    %c0_i32 = arith.constant 0 : i32
    %c0_i32_0 = arith.constant 0 : i32
    %c0_i32_1 = arith.constant 0 : i32
    return %arg0, %c0_i32, %c0_i32_0 : i32, i32, i32
  }
  func.func @transform_1(%arg0: i32, %arg1: i32) -> (i32, i32) {
    %c0_i32 = arith.constant 0 : i32
    %c0_i32_0 = arith.constant 0 : i32
    %c0_i32_1 = arith.constant 0 : i32
    return %c0_i32, %c0_i32_0 : i32, i32
  }
  func.func @transform_2(%arg0: i32, %arg1: i32) -> (i32, i32, i32) {
    %c0_i32 = arith.constant 0 : i32
    %c0_i32_0 = arith.constant 0 : i32
    return %arg0, %arg1, %c0_i32 : i32, i32, i32
  }
  func.func @transform_3(%arg0: i32, %arg1: i32) -> (i32, i32) {
    %c0_i32 = arith.constant 0 : i32
    %c0_i32_0 = arith.constant 0 : i32
    %c0_i32_1 = arith.constant 0 : i32
    return %c0_i32, %c0_i32_0 : i32, i32
  }
  func.func @transform_4(%arg0: i32, %arg1: i32) -> (i32, i32, i32) {
    %c0_i32 = arith.constant 0 : i32
    %c0_i32_0 = arith.constant 0 : i32
    return %arg0, %arg1, %c0_i32 : i32, i32, i32
  }
}

</mosaic_0001>

<bundles_post_ra>
// kernel: graph_convolution.1
= control target key start
LH: loop header
LB: loop body
LE: loop exit
PB: predicated region body
PF: predicated region fallthrough
CT: control target
= control target key end

     0   :  { %9 = vsyncpa [#allocation4], 0  ;;  %s975_s0 = inlined_call_operand.vmem [shape: f32[2,16,128], index: 0, kind: input, shape index: {}]   ;;  %s976_s1 = inlined_call_operand.vmem [shape: f32[128,128], index: 1, kind: input, shape index: {}]   ;;  %s977_s2 = inlined_call_operand.vmem [shape: f32[2,16,16], index: 2, kind: input, shape index: {}]   ;;  %s978_s3 = inlined_call_operand.vmem [shape: f32[1,128], index: 3, kind: input, shape index: {}]   ;;  %s979_s4 = inlined_call_operand.hbm [shape: f32[2,16,128], index: 4, kind: output, shape index: {}]  }
   0x1   :  { %11 = vsyncpa [#allocation4 + $0x1], 0  ;;  %s796_s15 = smov 0   ;;  %s798_s16 = smov 0  }
   0x2   :  { %s800_s17 = smov 0   ;;  %s802_s18 = smov 0  }
   0x3   :  { %s804_s19 = smov 0   ;;  %s806_s20 = smov 0  }
   0x4 LB: > { %s548_s21 = sadd.s32 4294967295, %s766_s20   ;;  %s549_s22 = sadd.s32 4294967294, %s766_s20   ;;  %s766_s20 = sphi %s806_s20, %s17_s20   ;;  %s762_s19 = sphi %s804_s19, %s986_s19   ;;  %s758_s18 = sphi %s802_s18, %s985_s18   ;;  %s754_s17 = sphi %s800_s17, %s984_s17   ;;  %s750_s16 = sphi %s798_s16, %s983_s16   ;;  %s746_s15 = sphi %s796_s15, %s982_s15  }
   0x5   : > { %s29_s23 = sadd.s32 1, %s762_s19  ;;  %s134_s24 = sadd.s32 1, %s754_s17 }
   0x6   : > { %p31_p0 = scmp.ge.s32.totalorder %s29_s23, 2  ;;  %p144_p1 = scmp.ne.s32.totalorder %s754_s17, %s750_s16 }
   0x7   : > { %p145_p2 = scmp.eq.s32.totalorder %s548_s21, 1  ;;  %p150_p3 = scmp.ne.s32.totalorder %s750_s16, %s746_s15 }
   0x8   : > { %s988_s23 = smov (%p31_p0, %s29_s23), 0  ;;  %p151_p5 = scmp.eq.s32.totalorder %s549_s22, 1 }
   0x9   : > { %p836_p4 = por %p145_p2, %p144_p1  ;;  %s129_s26 = ssub.s32 %s762_s19, %s988_s23 }
   0xa   : > { %p552_p6 = scmp.ge.s32.totalorder %s766_s20, 1  ;;  %p132_p7 = scmp.eq.s32.totalorder %s129_s26, 0 }
   0xb   : > { %p843_p8 = por %p151_p5, %p150_p3  ;;  %p196_p9 = scmp.lt.s32.totalorder %s766_s20, 3 }
   0xc   : > { %s849_s28 = scalar_select %p132_p7, %s754_s17, %s134_s24  }
   0xd   : > { %p197_p10 = pnand %p552_p6, %p196_p9 }
   0xe   : > { %p231_p11 = scmp.lt.s32.totalorder (!%p197_p10), %s758_s18, 1  ;;  %s568_s30 = sshll.u32 (!%p197_p10), %s758_s18, 8 }
   0xf   : > { %200 = sbr.rel (%p197_p10) target bundleno = 461 (0x1cd), region = 36  ;;  %s928_s7 = scalar_lea.hbm (!%p197_p10), %s979_s4, %s568_s30 }
  0x14   : > { %v268_v0 = vld [vmem:[%s976_s1 + $0x78] sm:$0xff]  ;;  %v267_v1 = vld [vmem:[%s976_s1 + $0x70] sm:$0xff]  ;;  %v266_v2 = vld [vmem:[%s976_s1 + $0x68] sm:$0xff]  ;;  %s862_s9 = scalar_select %p231_p11, %s758_s18, 1  ;;  %vm357_vm0 = vcmask 130048  }
  0x15   : > { %591 = vmatprep.subr.mxu0 %v268_v0  ;;  %v265_v3 = vld [vmem:[%s976_s1 + $0x60] sm:$0xff]  ;;  %v264_v4 = vld [vmem:[%s976_s1 + $0x58] sm:$0xff]  ;;  %v263_v6 = vld [vmem:[%s976_s1 + $0x50] sm:$0xff]  ;;  %s768_s18 = smov [#allocation3]  }
  0x16   : > { %592 = vmatpush3.msra.mxu0 %v268_v0  ;;  %s566_s12 = sshll.u32 %s862_s9, 4  ;;  %v262_v7 = vld [vmem:[%s976_s1 + $0x48] sm:$0xff]  ;;  %v261_v8 = vld [vmem:[%s976_s1 + $0x40] sm:$0xff]  ;;  %v260_v9 = vld [vmem:[%s976_s1 + $0x38] sm:$0xff]  ;;  %s694_s11 = sshll.u32 %s768_s18, 4  ;;  %s695_s11 = int_to_ptr.vmem [resolvable:$false] %s694_s11 }
  0x17   : > { %593 = vmatprep.subr.mxu0 %v267_v1  ;;  %s873_s21 = scalar_lea.vmem %s975_s0, %s566_s12  ;;  %v259_v10 = vld [vmem:[%s976_s1 + $0x30] sm:$0xff]  ;;  %v258_v11 = vld [vmem:[%s976_s1 + $0x28] sm:$0xff]  ;;  %v257_v12 = vld [vmem:[%s976_s1 + $0x20] sm:$0xff]  ;;  %s244_s22 = scalar_lea.vmem %s977_s2, %s566_s12 }
  0x18   : > { %594 = vmatpush3.msra.mxu0 %v267_v1  ;;  %v251_v5 = vld [vmem:[%s873_s21] sm:$0xff]  ;;  %v256_v13 = vld [vmem:[%s976_s1 + $0x18] sm:$0xff]  ;;  %v255_v14 = vld [vmem:[%s976_s1 + $0x10] sm:$0xff]  ;;  %s696_s13 = scalar_lea.vmem %s695_s11, 512 }
  0x19   : > { %595 = vmatprep.subr.mxu0 %v266_v2  ;;  %623 = vmatprep.mubr.f32.mxu0 %v251_v5  ;;  %v254_v15 = vld [vmem:[%s976_s1 + $0x8] sm:$0xff]  ;;  %v253_v16 = vld [vmem:[%s976_s1] sm:$0xff] }
  0x1a   : > { %596 = vmatpush3.msra.mxu0 %v266_v2  ;;  %v252_v17 = vld [vmem:[%s873_s21 + $0x8] sm:$0xff]  ;;  %v346_v18 = vld [vmem:[%s244_s22] sm:$0xff]  ;;  %s228_s21 = sand.u32 1, %s750_s16  }
  0x1b   : > { %597 = vmatprep.subr.mxu0 %v265_v3  ;;  %630 = vmatprep.mubr.msk.f32.mxu1 %vm357_vm0, %v346_v18  ;;  %v347_v21 = vld [vmem:[%s244_s22 + $0x8] sm:$0xff]  ;;  %s553_s24 = sshll.u32 %s228_s21, 4  ;;  %v558_v22 = vld [vmem:[%s978_s3] ss:$0 sm:$0xff]  ;;  %s930_s8 = scalar_lea.sflag [#allocation4], %s228_s21 }
  0x1c   : > { %598 = vmatpush3.msra.mxu0 %v265_v3  ;;  %s230_s12 = scalar_lea.vmem [#allocation3], %s553_s24 }
  0x1d   : > { %599 = vmatprep.subr.mxu0 %v264_v4  ;;  %s457_s29 = sshll.u32 %s230_s12, 4  ;;  %s923_s29 = int_to_ptr.vmem [resolvable:$true] %s457_s29 }
  0x1e   : > { %600 = vmatpush3.msra.mxu0 %v264_v4  ;;  %s690_s10 = scalar_lea.vmem %s923_s29, 256  ;;  %p697_p1 = scmp.lt.s32.totalorder %s923_s29, %s695_s11 }
  0x1f   : > { %601 = vmatprep.subr.mxu0 %v263_v6  ;;  %p691_p12 = scmp.ne.s32.totalorder %s923_s29, %s690_s10  ;;  %p698_p2 = scmp.lt.s32.totalorder %s696_s13, %s690_s10 }
  0x20   : > { %602 = vmatpush3.msra.mxu0 %v263_v6 }
  0x21   : > { %603 = vmatprep.subr.mxu0 %v262_v7  ;;  %p692_p13 = pnand %p691_p12, %p836_p4  ;;  %p699_p3 = por %p698_p2, %p697_p1 }
  0x22   : > { %604 = vmatpush3.msra.mxu0 %v262_v7 }
  0x23   : > { %605 = vmatprep.subr.mxu0 %v261_v8  ;;  %p693_p0 = pneg %p692_p13 }
  0x24   : > { %606 = vmatpush3.msra.mxu0 %v261_v8 }
  0x25   : > { %607 = vmatprep.subr.mxu0 %v260_v9  ;;  %p700_p5 = pnand %p699_p3, %p693_p0 }
  0x26   : > { %608 = vmatpush3.msra.mxu0 %v260_v9 }
  0x27   : > { %609 = vmatprep.subr.mxu0 %v259_v10 }
  0x28   : > { %610 = vmatpush3.msra.mxu0 %v259_v10 }
  0x29   : > { %611 = vmatprep.subr.mxu0 %v258_v11 }
  0x2a   : > { %612 = vmatpush3.msra.mxu0 %v258_v11 }
  0x2b   : > { %613 = vmatprep.subr.mxu0 %v257_v12 }
  0x2c   : > { %614 = vmatpush3.msra.mxu0 %v257_v12 }
  0x2d   : > { %615 = vmatprep.subr.mxu0 %v256_v13 }
  0x2e   : > { %616 = vmatpush3.msra.mxu0 %v256_v13 }
  0x2f   : > { %617 = vmatprep.subr.mxu0 %v255_v14 }
  0x30   : > { %618 = vmatpush3.msra.mxu0 %v255_v14 }
  0x31   : > { %619 = vmatprep.subr.mxu0 %v254_v15 }
  0x32   : > { %620 = vmatpush3.msra.mxu0 %v254_v15 }
  0x33   : > { %621 = vmatprep.subr.mxu0 %v253_v16 }
  0x34   : > { %622 = vmatpush3.msra.mxu0 %v253_v16 }
  0x35   : > { %624 = vmatmul.mubr.f32.vlgmr.msra.gmra.mxu0 %v252_v17 }
  0xf5   : > { %v625_v19 = vpop.f32.mrf.mxu0 }
  0xf6   : > { %626 = vmatprep.subr.mxu1 %v625_v19 }
  0xf7   : > { %v335_v20 = vpop.f32.mrf.mxu0  ;;  %627 = vmatpush3.msra.mxu1 %v625_v19 }
  0xf8   : > { %628 = vmatprep.subr.mxu1 %v335_v20 }
  0xf9   : > { %629 = vmatpush3.msra.mxu1 %v335_v20 }
  0xfa   : > { %631 = vmatmul.mubr.msk.f32.vlgmr.msra.gmra.mxu1 %vm357_vm0, %v347_v21 }
 0x1ba   : > { %v632_v23 = vpop.f32.mrf.mxu1 }
 0x1bb   : > { %v436_v24 = vadd.f32 %v632_v23, %v558_v22 }
 0x1bc   : > { %v430_v25 = vpop.f32.mrf.mxu1 }
 0x1bd   : > { %440 = vst [vmem:[%s230_s12 + $0x8] sm:$0xff] %v436_v24  ;;  %v431_v26 = vadd.f32 %v558_v22, %v430_v25 }
 0x1bf   : > { %439 = vst [vmem:[%s230_s12] sm:$0xff] %v431_v26 }
 0x1c0   : > { %703 = shalt.err (!%p700_p5)
}
 0x1c1   : > { %s704_s14 = scalar_lea.hbm %s928_s7, 256  ;;  %s708_s24 = scalar_lea.hbm %s979_s4, 512 }
 0x1c2   : > { %p705_p6 = scmp.ne.s32.totalorder %s928_s7, %s704_s14  ;;  %p709_p10 = scmp.lt.s32.totalorder %s928_s7, %s979_s4 }
 0x1c3   : > { %p710_p11 = scmp.lt.s32.totalorder %s708_s24, %s704_s14 }
 0x1c4   : > { %p706_p7 = pnand %p705_p6, %p836_p4 }
 0x1c5   : > { %p711_p12 = por %p710_p11, %p709_p10 }
 0x1c6   : > { %p707_p9 = pneg %p706_p7 }
 0x1c8   : > { %p712_p13 = pnand %p711_p12, %p707_p9 }
 0x1ca   : > { %715 = shalt.err (!%p712_p13)
}
 0x1cb   : > { %s769_s12 = smov 128   ;;  %s770_s30 = smov 8  }
 0x1cc   : > { %633 = dma.vmem_to_hbm [thread:$0]  (%p836_p4), %s923_s29, 256, %s928_s7, %s930_s8, %s769_s12, %s769_s12, %s770_s30  }
 0x1cd PF: > { %p639_p0 = scmp.ge.s32.totalorder %s766_s20, 2  ;;  %s472_s5 = sand.u32 1, %s746_s15  }
 0x1ce   : > { %s473_s6 = scalar_lea.sflag [#allocation4], %s472_s5 }
 0x1cf   : > { %p636_p1 = pnand %p639_p0, %p843_p8 }
 0x1d1   : > { %p637_p2 = pneg %p636_p1 }
 0x1d3   : > { %741 = dma.done.wait (%p637_p2), %s473_s6, 256  }
 0x1d4   : > { %743 = vsyncadd (%p637_p2), %s473_s6, 4294967040  ;;  %s17_s20 = sadd.s32 1, %s766_s20   ;;  %s982_s15 = smov %s750_s16 }
 0x1d5   : > { %p14_p3 = scmp.ge.s32.totalorder %s17_s20, 4   ;;  %s983_s16 = smov %s754_s17 }
 0x1d6   : > { %s984_s17 = smov %s849_s28  ;;  %s985_s18 = smov %s762_s19 }
 0x1d7   : > { %s986_s19 = smov %s988_s23  ;;  %16 = sbr.rel (!%p14_p3) target bundleno = 4 (0x4), region = 78 }
 0x1dc   :  { %478 = vsyncpa [#allocation4], 1 }
 0x1dd   :  { %480 = vsyncpa [#allocation4 + $0x1], 1 }

</bundles_post_ra>
